<compile_context>
chip_gen: v7x
topology: tpu7x:2x2x1
jax: 0.10.0
libtpu: 0.0.40
codegen_flags: <defaults>
</compile_context>

<pallas_src>
import functools

import jax
import jax.numpy as jnp
import numpy as np
from jax.experimental import pallas as pl
from jax.experimental.pallas import tpu as pltpu


def _round_up(x, m):
    return (x + m - 1) // m * m


# --------------------------------------------------------------------------
# Stage 1a: full-HW-in-one-tile path (the common case).  Straight store.
# --------------------------------------------------------------------------
def _sqdiff_sum_single_kernel(pred_ref, gt_ref, out_ref):
    diff = pred_ref[...].astype(jnp.float32) - gt_ref[...].astype(jnp.float32)
    out_ref[...] = jnp.sum(diff * diff, axis=-1, keepdims=True)


# --------------------------------------------------------------------------
# Stage 1b: HW-tiled path (only for heatmaps too large for one VMEM block).
# Per-128-lane partial sums accumulate in a VMEM scratch with plain VPU adds;
# the lane reduce + (b_tile, J, 1) store happen only on the last k step.
# Ragged last HW block is masked in-kernel (no wrapper padding).
# --------------------------------------------------------------------------
def _sqdiff_sum_multi_kernel(pred_ref, gt_ref, out_ref, acc_ref, *, hw, hw_tile):
    k = pl.program_id(1)

    @pl.when(k == 0)
    def _():
        acc_ref[...] = jnp.zeros_like(acc_ref)

    diff = pred_ref[...].astype(jnp.float32) - gt_ref[...].astype(jnp.float32)
    sq = diff * diff

    if hw % hw_tile != 0:
        # Only emitted when a ragged last HW block is possible: mask lanes
        # beyond the true HW extent so garbage never leaks into valid rows.
        lane = jax.lax.broadcasted_iota(jnp.int32, sq.shape, 2)
        sq = jnp.where(k * hw_tile + lane < hw, sq, 0.0)

    acc = acc_ref[...]
    for c in range(hw_tile // 128):                 # static, lane-aligned slices
        acc = acc + sq[:, :, c * 128:(c + 1) * 128]
    acc_ref[...] = acc

    @pl.when(k == pl.num_programs(1) - 1)
    def _():
        out_ref[...] = jnp.sum(acc_ref[...], axis=-1, keepdims=True)


# --------------------------------------------------------------------------
# Stage 2: OHKM epilogue on (B, J, 1) per-joint sums -> (1, 1, 1) scalar.
# --------------------------------------------------------------------------
def _ohkm_epilogue_kernel(*refs, batch, joints, topk, inv_hw_half,
                          use_target_weight):
    if use_target_weight:
        loss_ref, tw_ref, out_ref = refs
    else:
        loss_ref, out_ref = refs

    loss = loss_ref[...] * inv_hw_half              # (B, J, 1): 0.5 * mean over HW
    if use_target_weight:
        w = tw_ref[...].astype(jnp.float32)         # (B, J, 1)
        loss = loss * (w * w)                       # weight folded out of HW loop

    # torch.topk reproduced by k rounds of (max over joints, mask first
    # occurrence); the SUM of selected values is identical even with ties.
    col = jax.lax.broadcasted_iota(jnp.int32, (batch, joints, 1), 1)
    vals = loss
    total = jnp.zeros((batch, 1, 1), jnp.float32)
    for _ in range(topk):
        m = jnp.max(vals, axis=1, keepdims=True)                     # (B, 1, 1)
        total = total + m
        is_max = vals == m
        first = jnp.min(jnp.where(is_max, col, joints), axis=1, keepdims=True)
        vals = jnp.where(col == first, -jnp.inf, vals)

    out_ref[...] = jnp.sum(total, axis=0, keepdims=True) / (topk * batch)


# --------------------------------------------------------------------------
# Wrapper
# --------------------------------------------------------------------------
def joints_ohkm_mse_loss(output, target, target_weight=None, *,
                         use_target_weight=True, topk=8,
                         block_bytes_max=None):
    B, J, H, W = output.shape
    hw = H * W
    if not (1 <= topk <= J):
        raise ValueError(f"topk={topk} must be in [1, num_joints={J}]")
    if use_target_weight and target_weight is None:
        raise ValueError("target_weight is required when use_target_weight=True")

    # Metadata-only reshapes; inputs keep their native dtype (bf16 OK).
    pred = output.reshape(B, J, hw)
    gt = target.reshape(B, J, hw)

    # ---- VMEM budget from the local chip (64 MiB v7x / 128 MiB v5e,v6e) ----
    try:
        info = pltpu.get_tpu_info()
        vmem_phys = int(getattr(info, "vmem_capacity_bytes", 64 << 20))
    except Exception:
        vmem_phys = 64 << 20
    if block_bytes_max is None:
        # 2 inputs x 2 pipeline buffers x block  ->  ~40% of physical VMEM.
        block_bytes_max = max(1 << 20, vmem_phys // 10)
    vmem_limit = int(min(vmem_phys - (4 << 20),
                         4 * block_bytes_max + (24 << 20)))

    elem = max(output.dtype.itemsize, target.dtype.itemsize)

    # ---- HW (lane / reduction) tiling: whole HW in one tile if it fits ----
    sample_bytes = J * hw * elem
    if sample_bytes <= block_bytes_max:
        hw_tile, n_hw = hw, 1
    else:
        hw_tile = max(128, (block_bytes_max // (J * elem)) // 128 * 128)
        hw_tile = min(hw_tile, _round_up(hw, 128))
        n_hw = pl.cdiv(hw, hw_tile)
        assert hw_tile % 128 == 0

    # ---- Batch (parallel) tiling: big blocks, but >=2 blocks for megacore ----
    cap = max(1, block_bytes_max // (J * hw_tile * elem))
    b_tile = min(B, cap)
    if B > 1:
        n_b = max(2, pl.cdiv(B, b_tile))
        n_b = n_b + (n_b % 2)            # even block count -> balanced v7x cores
        b_tile = pl.cdiv(B, n_b)
    n_b = pl.cdiv(B, b_tile)
    # NOTE: ragged last batch block needs no masking: garbage rows only reach
    # output rows beyond B, which Pallas drops on writeback.

    if n_hw == 1:
        kernel = _sqdiff_sum_single_kernel
        grid = (n_b,)
        in_specs = [pl.BlockSpec((b_tile, J, hw), lambda i: (i, 0, 0))] * 2
        out_specs = pl.BlockSpec((b_tile, J, 1), lambda i: (i, 0, 0))
        scratch = []
        dims = ("parallel",)
    else:
        kernel = functools.partial(_sqdiff_sum_multi_kernel, hw=hw, hw_tile=hw_tile)
        grid = (n_b, n_hw)
        in_specs = [pl.BlockSpec((b_tile, J, hw_tile), lambda i, k: (i, 0, k))] * 2
        out_specs = pl.BlockSpec((b_tile, J, 1), lambda i, k: (i, 0, 0))
        scratch = [pltpu.VMEM((b_tile, J, 128), jnp.float32)]
        dims = ("parallel", "arbitrary")

    sq_sum = pl.pallas_call(
        kernel,
        out_shape=jax.ShapeDtypeStruct((B, J, 1), jnp.float32),
        grid_spec=pltpu.PrefetchScalarGridSpec(
            num_scalar_prefetch=0,
            grid=grid,
            in_specs=in_specs,
            out_specs=out_specs,
            scratch_shapes=scratch),
        compiler_params=pltpu.CompilerParams(
            dimension_semantics=dims,
            vmem_limit_bytes=vmem_limit),
    )(pred, gt)

    epilogue = functools.partial(
        _ohkm_epilogue_kernel, batch=B, joints=J, topk=topk,
        inv_hw_half=0.5 / hw, use_target_weight=use_target_weight)

    args = [sq_sum]
    if use_target_weight:
        args.append(target_weight.reshape(B, J, 1))   # metadata-only reshape

    out = pl.pallas_call(
        epilogue,
        out_shape=jax.ShapeDtypeStruct((1, 1, 1), jnp.float32),
        in_specs=[pl.BlockSpec(memory_space=pltpu.MemorySpace.VMEM)] * len(args),
        out_specs=pl.BlockSpec(memory_space=pltpu.MemorySpace.VMEM),
    )(*args)
    return out[0, 0, 0]


# --------------------------------------------------------------------------
# Pure-JAX reference matching the PyTorch module's forward.
# --------------------------------------------------------------------------
def _reference(output, target, target_weight, *, use_target_weight=True, topk=8):
    B, J = output.shape[:2]
    pred = output.reshape(B, J, -1).astype(jnp.float32)
    gt = target.reshape(B, J, -1).astype(jnp.float32)
    if use_target_weight:
        w = target_weight.reshape(B, J, 1).astype(jnp.float32)
        pred = pred * w
        gt = gt * w
    loss = 0.5 * jnp.mean((pred - gt) ** 2, axis=-1)    # (B, J)
    topk_vals, _ = jax.lax.top_k(loss, topk)
    return jnp.mean(jnp.sum(topk_vals, axis=-1) / topk)


if __name__ == "__main__":
    # JointsOHKMMSELoss(use_target_weight=..., topk=8); no learnable parameters.
    B, J, H, W = 2, 16, 16, 16
    TOPK = 8

    key = jax.random.PRNGKey(0)
    k1, k2, k3 = jax.random.split(key, 3)
    output = jax.random.normal(k1, (B, J, H, W), dtype=jnp.float32)
    target = jax.random.normal(k2, (B, J, H, W), dtype=jnp.float32)
    target_weight = jax.random.uniform(k3, (B, J, 1), dtype=jnp.float32)

    # use_target_weight=True path
    loss_w = jax.block_until_ready(
        joints_ohkm_mse_loss(output, target, target_weight,
                             use_target_weight=True, topk=TOPK))
    ref_w = _reference(output, target, target_weight,
                       use_target_weight=True, topk=TOPK)
    np.testing.assert_allclose(np.asarray(loss_w), np.asarray(ref_w),
                               rtol=1e-4, atol=1e-6)

    # use_target_weight=False path (target_weight never DMA'd)
    loss_nw = jax.block_until_ready(
        joints_ohkm_mse_loss(output, target, target_weight,
                             use_target_weight=False, topk=TOPK))
    ref_nw = _reference(output, target, target_weight,
                        use_target_weight=False, topk=TOPK)
    np.testing.assert_allclose(np.asarray(loss_nw), np.asarray(ref_nw),
                               rtol=1e-4, atol=1e-6)

    # Ragged / multi-block case: J=17 (not a multiple of 8) and a batch that
    # does not divide the batch tile -> exercises padding-free ragged edges.
    B2, J2, H2, W2 = 9, 17, 24, 24
    k4, k5, k6 = jax.random.split(jax.random.PRNGKey(1), 3)
    output2 = jax.random.normal(k4, (B2, J2, H2, W2), dtype=jnp.float32)
    target2 = jax.random.normal(k5, (B2, J2, H2, W2), dtype=jnp.float32)
    tw2 = jax.random.uniform(k6, (B2, J2, 1), dtype=jnp.float32)
    loss2 = jax.block_until_ready(
        joints_ohkm_mse_loss(output2, target2, tw2,
                             use_target_weight=True, topk=TOPK))
    ref2 = _reference(output2, target2, tw2, use_target_weight=True, topk=TOPK)
    np.testing.assert_allclose(np.asarray(loss2), np.asarray(ref2),
                               rtol=1e-4, atol=1e-6)

    # Force the HW-tiled path (tiny per-block budget) to exercise the scratch
    # accumulator + ragged-lane masking kernel as well.
    loss3 = jax.block_until_ready(
        joints_ohkm_mse_loss(output2, target2, tw2,
                             use_target_weight=True, topk=TOPK,
                             block_bytes_max=32 * 1024))
    np.testing.assert_allclose(np.asarray(loss3), np.asarray(ref2),
                               rtol=1e-4, atol=1e-6)

    print("KERNEL_OK")
</pallas_src>

<mosaic_0001>
module attributes {stable_mosaic.version = 11 : i64} {
  func.func @_sqdiff_sum_single_kernel(%arg0: i32, %arg1: memref<1x16x256xf32, #tpu.memory_space<vmem>>, %arg2: memref<1x16x256xf32, #tpu.memory_space<vmem>>, %arg3: memref<1x16x1xf32, #tpu.memory_space<vmem>>) attributes {dimension_semantics = [#tpu.dimension_semantics<parallel>], iteration_bounds = array<i64: 2>, scalar_prefetch = 0 : i64, scratch_operands = 0 : i64, tpu.core_type = #tpu.core_type<tc>, window_params = [{transform_indices = @transform_0, window_bounds = array<i64: 1, 16, 256>}, {transform_indices = @transform_1, window_bounds = array<i64: 1, 16, 256>}, {transform_indices = @transform_2, window_bounds = array<i64: 1, 16, 1>}]} {
    %c0 = arith.constant 0 : index
    %c0_0 = arith.constant 0 : index
    %c0_1 = arith.constant 0 : index
    %0 = vector.load %arg1[%c0, %c0_0, %c0_1] : memref<1x16x256xf32, #tpu.memory_space<vmem>>, vector<1x16x256xf32>
    %c0_2 = arith.constant 0 : index
    %c0_3 = arith.constant 0 : index
    %c0_4 = arith.constant 0 : index
    %1 = vector.load %arg2[%c0_2, %c0_3, %c0_4] : memref<1x16x256xf32, #tpu.memory_space<vmem>>, vector<1x16x256xf32>
    %2 = arith.subf %0, %1 : vector<1x16x256xf32>
    %3 = arith.mulf %2, %2 : vector<1x16x256xf32>
    %cst = arith.constant dense<0.000000e+00> : vector<1x16xf32>
    %4 = vector.multi_reduction <add>, %3, %cst [2] : vector<1x16x256xf32> to vector<1x16xf32>
    %5 = vector.shape_cast %4 : vector<1x16xf32> to vector<1x16x1xf32>
    %c0_5 = arith.constant 0 : index
    %c0_6 = arith.constant 0 : index
    %c0_7 = arith.constant 0 : index
    %6 = vector.load %arg3[%c0_5, %c0_6, %c0_7] : memref<1x16x1xf32, #tpu.memory_space<vmem>>, vector<1x16x1xf32>
    tpu.vector_store %arg3[%c0_5, %c0_6, %c0_7], %5 {strides = array<i32>} : memref<1x16x1xf32, #tpu.memory_space<vmem>>, vector<1x16x1xf32>,
    return
  }
  func.func @transform_0(%arg0: i32) -> (i32, i32, i32) {
    %c0_i32 = arith.constant 0 : i32
    %c0_i32_0 = arith.constant 0 : i32
    %c0_i32_1 = arith.constant 0 : i32
    return %arg0, %c0_i32, %c0_i32_0 : i32, i32, i32
  }
  func.func @transform_1(%arg0: i32) -> (i32, i32, i32) {
    %c0_i32 = arith.constant 0 : i32
    %c0_i32_0 = arith.constant 0 : i32
    %c0_i32_1 = arith.constant 0 : i32
    return %arg0, %c0_i32, %c0_i32_0 : i32, i32, i32
  }
  func.func @transform_2(%arg0: i32) -> (i32, i32, i32) {
    %c0_i32 = arith.constant 0 : i32
    %c0_i32_0 = arith.constant 0 : i32
    %c0_i32_1 = arith.constant 0 : i32
    return %arg0, %c0_i32, %c0_i32_0 : i32, i32, i32
  }
}

</mosaic_0001>

<bundles_post_ra>
// kernel: tpu_custom_call.1
= control target key start
LH: loop header
LB: loop body
LE: loop exit
PB: predicated region body
PF: predicated region fallthrough
CT: control target
= control target key end

     0   :  { %7 = vsyncpa [#allocation3], 0  ;;  %s671_s0 = inlined_call_operand.hbm [shape: f32[2,16,256], index: 0, kind: input, shape index: {}]   ;;  %s672_s1 = inlined_call_operand.hbm [shape: f32[2,16,256], index: 1, kind: input, shape index: {}]   ;;  %s673_s2 = inlined_call_operand.vmem [shape: f32[2,16,1], index: 2, kind: output, shape index: {}]  }
   0x1   :  { %9 = vsyncpa [#allocation3 + $0x1], 0 }
   0x2   :  { %10 = vsyncpa [#allocation5], 0 }
   0x3   :  { %12 = vsyncpa [#allocation5 + $0x1], 0  ;;  %s503_s9 = smov 0   ;;  %s505_s10 = smov 0  }
   0x4   :  { %s507_s11 = smov 0   ;;  %s509_s12 = smov 0  }
   0x5 LB: > { %s522_s13 = sadd.s32 4294967295, %s482_s12   ;;  %s525_s14 = sadd.s32 1, %s482_s12   ;;  %s482_s12 = sphi %s509_s12, %s683_s12   ;;  %s478_s11 = sphi %s507_s11, %s682_s11   ;;  %s474_s10 = sphi %s505_s10, %s681_s10   ;;  %s470_s9 = sphi %s503_s9, %s680_s9  }
   0x6   : > { %s22_s15 = ssub.s32 %s482_s12, %s525_s14  ;;  %s25_s16 = sadd.s32 1, %s478_s11 }
   0x7   : > { %p23_p0 = scmp.eq.s32.totalorder %s22_s15, 0  ;;  %p32_p1 = scmp.ne.s32.totalorder %s478_s11, %s474_s10 }
   0x8   : > { %p33_p2 = scmp.eq.s32.totalorder %s482_s12, 0  ;;  %p38_p3 = scmp.ne.s32.totalorder %s474_s10, %s470_s9 }
   0x9   : > { %s535_s17 = scalar_select %p23_p0, %s478_s11, %s25_s16  }
   0xa   : > { %p34_p4 = por %p33_p2, %p32_p1  ;;  %p39_p5 = scmp.eq.s32.totalorder %s522_s13, 0 }
   0xb   : > { %p349_p6 = scmp.lt.s32.totalorder %s482_s12, 2  ;;  %s544_s19 = sand.u32 1, %s478_s11  }
   0xc   : > { %p539_p7 = por %p39_p5, %p38_p3  ;;  %s322_s20 = sshll.u32 %s544_s19, 5 }
   0xd   : > { %s335_s21 = sshll.u32 %s482_s12, 9  ;;  %s118_s25 = scalar_lea.vmem [#allocation2], %s322_s20 }
   0xe   : > { %s675_s18 = scalar_select %p539_p7, 1, 0 }
   0xf   : > { %s553_s24 = scalar_lea.hbm %s671_s0, %s335_s21  ;;  %s125_s26 = sshll.u32 %s118_s25, 4  ;;  %s557_s26 = int_to_ptr.vmem [resolvable:$true] %s125_s26 }
  0x10   : > { %p559_p8 = pnand %p349_p6, %p34_p4  ;;  %s115_s28 = scalar_lea.sflag [#allocation3], %s544_s19 }
  0x11   : > { %s384_s29 = scalar_lea.hbm %s553_s24, 512  ;;  %s389_s4 = scalar_lea.hbm %s671_s0, 1024 }
  0x12   : > { %p385_p10 = scmp.ne.s32.totalorder %s553_s24, %s384_s29  ;;  %p386_p11 = pneg %p559_p8 }
  0x13   : > { %p390_p0 = scmp.lt.u32.totalorder %s553_s24, %s671_s0  ;;  %p391_p1 = scmp.lt.u32.totalorder %s389_s4, %s384_s29 }
  0x14   : > { %p387_p12 = pnand %p386_p11, %p385_p10  ;;  %p393_p3 = scmp.lt.u32.totalorder %s384_s29, %s553_s24 }
  0x15   : > { %p392_p2 = por %p391_p1, %p390_p0 }
  0x16   : > { %p388_p13 = pneg %p387_p12 }
  0x17   : > { %p394_p4 = por %p393_p3, %p392_p2 }
  0x19   : > { %p395_p5 = pnand %p394_p4, %p388_p13 }
  0x1b   : > { %398 = shalt.err (!%p395_p5)
}
  0x1c   : > { %s399_s7 = scalar_lea.vmem %s557_s26, 512  ;;  %s484_s8 = smov [#allocation2]  }
  0x1d   : > { %p400_p6 = scmp.ne.s32.totalorder %s557_s26, %s399_s7  ;;  %s404_s9 = sshll.u32 %s484_s8, 4  ;;  %s405_s9 = int_to_ptr.vmem [resolvable:$false] %s404_s9 }
  0x1e   : > { %s406_s15 = scalar_lea.vmem %s405_s9, 1024  ;;  %p407_p9 = scmp.lt.s32.totalorder %s557_s26, %s405_s9 }
  0x1f   : > { %p402_p10 = pnand %p400_p6, %p386_p11  ;;  %p408_p0 = scmp.lt.s32.totalorder %s406_s15, %s399_s7 }
  0x21   : > { %p403_p12 = pneg %p402_p10  ;;  %p409_p1 = por %p408_p0, %p407_p9 }
  0x23   : > { %p410_p2 = pnand %p409_p1, %p403_p12 }
  0x25   : > { %413 = shalt.err (!%p410_p2)
}
  0x26   : > { %s485_s16 = smov 256   ;;  %s486_s22 = smov 16  }
  0x27   : > { %345 = dma.hbm_to_vmem [thread:$0]  (!%p559_p8), %s553_s24, 512, %s557_s26, %s115_s28, %s485_s16, %s485_s16, %s486_s22  }
  0x28   : > { %p154_p9 = scmp.lt.s32.totalorder %s482_s12, 3  ;;  %s601_s29 = scalar_lea.hbm %s672_s1, %s335_s21 }
  0x29   : > { %p677_p13 = scmp.ge.s32.totalorder %s482_s12, 1  ;;  %s139_s3 = scalar_lea.vmem [#allocation4], %s322_s20 }
  0x2a   : > { %s146_s4 = sshll.u32 %s139_s3, 4  ;;  %s136_s24 = scalar_lea.sflag [#allocation5], %s544_s19  ;;  %s611_s4 = int_to_ptr.vmem [resolvable:$true] %s146_s4 }
  0x2b   : > { %p605_p3 = pnand %p677_p13, %p154_p9  ;;  %s414_s26 = scalar_lea.hbm %s601_s29, 512 }
  0x2c   : > { %p415_p4 = scmp.ne.s32.totalorder %s601_s29, %s414_s26  ;;  %s419_s28 = scalar_lea.hbm %s672_s1, 1024 }
  0x2d   : > { %p420_p10 = scmp.lt.u32.totalorder %s601_s29, %s672_s1  ;;  %p421_p12 = scmp.lt.u32.totalorder %s419_s28, %s414_s26 }
  0x2e   : > { %p417_p5 = pnand %p415_p4, %p386_p11  ;;  %p423_p1 = scmp.lt.u32.totalorder %s414_s26, %s601_s29 }
  0x2f   : > { %p422_p0 = por %p421_p12, %p420_p10 }
  0x30   : > { %p418_p6 = pneg %p417_p5 }
  0x31   : > { %p424_p2 = por %p423_p1, %p422_p0 }
  0x33   : > { %p425_p9 = pnand %p424_p2, %p418_p6 }
  0x35   : > { %428 = shalt.err (!%p425_p9)
}
  0x36   : > { %s429_s20 = scalar_lea.vmem %s611_s4, 512  ;;  %s487_s7 = smov [#allocation4]  }
  0x37   : > { %p430_p13 = scmp.ne.s32.totalorder %s611_s4, %s429_s20  ;;  %s434_s8 = sshll.u32 %s487_s7, 4  ;;  %s435_s8 = int_to_ptr.vmem [resolvable:$false] %s434_s8 }
  0x38   : > { %s436_s9 = scalar_lea.vmem %s435_s8, 1024  ;;  %p437_p7 = scmp.lt.s32.totalorder %s611_s4, %s435_s8 }
  0x39   : > { %p432_p4 = pnand %p430_p13, %p386_p11  ;;  %p438_p10 = scmp.lt.s32.totalorder %s436_s9, %s429_s20 }
  0x3b   : > { %p433_p5 = pneg %p432_p4  ;;  %p439_p12 = por %p438_p10, %p437_p7 }
  0x3d   : > { %p440_p0 = pnand %p439_p12, %p433_p5 }
  0x3f   : > { %443 = shalt.err (!%p440_p0)
}
  0x40   : > { %348 = dma.hbm_to_vmem [thread:$0]  (!%p559_p8), %s601_s29, 512, %s611_s4, %s136_s24, %s485_s16, %s485_s16, %s486_s22  }
  0x41   : > { %158 = sbr.rel (%p605_p3) target bundleno = 230 (0xe6), region = 28  ;;  %s160_s15 = sand.u32 (!%p605_p3), 1, %s474_s10  }
  0x42   : > { %s329_s23 = sshll.u32 (!%p605_p3), %s160_s15, 5  ;;  %s161_s25 = scalar_lea.sflag (!%p605_p3), [#allocation3], %s160_s15 }
  0x43   : > { %s164_s3 = scalar_lea.vmem (!%p605_p3), [#allocation2], %s329_s23  ;;  %p679_p7 = scmp.ne.s32.totalorder (!%p605_p3), %s675_s18, 0 }
  0x48   : > { %461 = dma.done.wait (%p679_p7), %s161_s25, 512  }
  0x49   : > { %463 = vsyncadd (%p679_p7), %s161_s25, 4294966784  ;;  %s170_s27 = scalar_lea.sflag [#allocation5], %s160_s15  ;;  %s173_s19 = scalar_lea.vmem [#allocation4], %s329_s23 }
  0x4a   : > { %465 = dma.done.wait (%p679_p7), %s170_s27, 512  }
  0x4b   : > { %467 = vsyncadd (%p679_p7), %s170_s27, 4294966784  ;;  %v204_v0 = vld [vmem:[%s164_s3] sm:$0xff]  ;;  %v205_v1 = vld [vmem:[%s164_s3 + $0x8] sm:$0xff]  ;;  %p199_p8 = scmp.lt.s32.totalorder %s522_s13, 1  ;;  %vm226_vm0 = vcmask 7168  }
  0x4c   : > { %v208_v2 = vld [vmem:[%s173_s19] sm:$0xff]  ;;  %v209_v3 = vld [vmem:[%s173_s19 + $0x8] sm:$0xff]  ;;  %v206_v5 = vld [vmem:[%s164_s3 + $0x10] sm:$0xff] }
  0x4d   : > { %v212_v4 = vsub.f32 %v204_v0, %v208_v2  ;;  %v207_v6 = vld [vmem:[%s164_s3 + $0x18] sm:$0xff]  ;;  %v213_v7 = vsub.f32 %v205_v1, %v209_v3  ;;  %v210_v8 = vld [vmem:[%s173_s19 + $0x10] sm:$0xff]  ;;  %s685_s13 = smov (!%p199_p8, %s522_s13), 1 }
  0x4e   : > { %v211_v9 = vld [vmem:[%s173_s19 + $0x18] sm:$0xff]  ;;  %v214_v11 = vsub.f32 %v206_v5, %v210_v8  ;;  %s337_s18 = sshll.u32 %s685_s13, 4 }
  0x4f   : > { %v216_v10 = vmul.f32 %v212_v4, %v212_v4  ;;  %v215_v12 = vsub.f32 %v207_v6, %v211_v9  ;;  %v217_v13 = vmul.f32 %v213_v7, %v213_v7  ;;  %s203_s29 = scalar_lea.vmem %s673_s2, %s337_s18 }
  0x50   : > { %v218_v14 = vmul.f32 %v214_v11, %v214_v11 }
  0x51   : > { %v219_v15 = vmul.f32 %v215_v12, %v215_v12  ;;  %v220_v16 = vadd.f32 %v217_v13, %v216_v10 }
  0x53   : > { %221 = vadd.xlane.f32.xlu0 %v220_v16  ;;  %v223_v17 = vadd.f32 %v219_v15, %v218_v14 }
  0x57   : > { %224 = vadd.xlane.f32.xlu0 %v223_v17 }
  0xe0   : > { %v222_v18 = vpop.xlane.xlu0 %221 }
  0xe1   : > { %227 = vst.msk [vmem:[%s203_s29] sm:$0xff] %vm226_vm0, %v222_v18 }
  0xe4   : > { %v225_v19 = vpop.xlane.xlu0 %224 }
  0xe5   : > { %228 = vst.msk [vmem:[%s203_s29 + $0x8] sm:$0xff] %vm226_vm0, %v225_v19 }
  0xe6 PF: > { %p15_p11 = scmp.ge.s32.totalorder %s525_s14, 4   ;;  %s680_s9 = smov %s474_s10 }
  0xe7   : > { %s681_s10 = smov %s478_s11  ;;  %s682_s11 = smov %s535_s17 }
  0xe8   : > { %s683_s12 = smov %s525_s14  ;;  %17 = sbr.rel (!%p15_p11) target bundleno = 5 (0x5), region = 81 }
  0xef   :  { %250 = vsyncpa [#allocation3], 1 }
  0xf0   :  { %252 = vsyncpa [#allocation3 + $0x1], 1 }
  0xf1   :  { %253 = vsyncpa [#allocation5], 1 }
  0xf2   :  { %255 = vsyncpa [#allocation5 + $0x1], 1 }

</bundles_post_ra>
